<compile_context>
chip_gen: v6e
topology: v6e:2x2x1
jax: 0.10.0
libtpu: 0.0.40
codegen_flags: <defaults>
</compile_context>

<pallas_src>
import functools

import jax
import jax.numpy as jnp
from jax.experimental import pallas as pl
from jax.experimental.pallas import tpu as pltpu


_LANE = 128                # full lane width for f32
_TARGET_BLOCK_ROWS = 4096  # 4096 x 128 x 4 B = 2 MiB per plane block
_MIN_SPLIT_ROWS = 2048     # never split into blocks smaller than ~1 MiB


def _sigmoid_kernel(xr_ref, xi_ref, yr_ref, yi_ref):
    # Exact elementwise sigmoid on both planes.  exp rides the EUP slot; the
    # kernel is HBM-streaming bound, so compute is fully hidden under DMA.
    yr_ref[...] = 1.0 / (1.0 + jnp.exp(-xr_ref[...]))
    yi_ref[...] = 1.0 / (1.0 + jnp.exp(-xi_ref[...]))


def _choose_block_rows(M):
    """Pick the row-tile size for the lane-dense (M, 128) view."""
    if M <= 2 * _MIN_SPLIT_ROWS:
        # Small / medium input: one full-extent block.  Splitting here would
        # only add per-step overhead on single-TensorCore v5e/v6e chips and
        # produce sub-1-MiB DMAs.
        return M
    # Large input: ~2 MiB blocks (multiple of 8 sublanes).  Guarantees >= 2
    # grid steps, and many steps for big arrays so both v7x TensorCores keep
    # their DMA queues full.
    tm = min(_TARGET_BLOCK_ROWS, (pl.cdiv(M, 2) // 8) * 8)
    return max(tm, _MIN_SPLIT_ROWS)


@functools.partial(jax.jit)
def sigmoid_complex(x):
    """Pallas equivalent of the PyTorch Sigmoid module forward.

    x: complex64 array (any shape, e.g. NCHW [B, C, H, W]).
    Returns sigmoid(x.real) + 1j * sigmoid(x.imag), complex64.
    """
    orig_shape = x.shape
    xr = jnp.real(x).reshape(-1)
    xi = jnp.imag(x).reshape(-1)
    f_dtype = xr.dtype                      # float32 for complex64 input
    n = xr.shape[0]

    # Only pad to the next lane multiple (rare for NN shapes; zero here).
    pad = (-n) % _LANE
    if pad:
        xr = jnp.pad(xr, (0, pad))
        xi = jnp.pad(xi, (0, pad))
    M = (n + pad) // _LANE

    xr2 = xr.reshape(M, _LANE)
    xi2 = xi.reshape(M, _LANE)

    tm = _choose_block_rows(M)
    grid = (pl.cdiv(M, tm),)                # ragged last block is masked
    spec = pl.BlockSpec((tm, _LANE), lambda i: (i, 0))

    yr2, yi2 = pl.pallas_call(
        _sigmoid_kernel,
        out_shape=(
            jax.ShapeDtypeStruct((M, _LANE), f_dtype),
            jax.ShapeDtypeStruct((M, _LANE), f_dtype),
        ),
        grid_spec=pltpu.PrefetchScalarGridSpec(
            num_scalar_prefetch=0,
            grid=grid,
            in_specs=[spec, spec],
            out_specs=[spec, spec],
        ),
        input_output_aliases={0: 0, 1: 1},
        compiler_params=pltpu.CompilerParams(
            dimension_semantics=("parallel",),
            vmem_limit_bytes=32 * 1024 * 1024,
        ),
    )(xr2, xi2)

    yr = yr2.reshape(-1)
    yi = yi2.reshape(-1)
    if pad:
        yr = yr[:n]
        yi = yi[:n]
    yr = yr.reshape(orig_shape)
    yi = yi.reshape(orig_shape)
    return jax.lax.complex(yr, yi)


if __name__ == "__main__":
    key = jax.random.PRNGKey(0)
    kr, ki = jax.random.split(key)
    B, C, H, W = 2, 4, 16, 16  # NCHW, matching a typical conv activation shape
    xr = jax.random.normal(kr, (B, C, H, W), dtype=jnp.float32)
    xi = jax.random.normal(ki, (B, C, H, W), dtype=jnp.float32)
    x = jax.lax.complex(xr, xi).astype(jnp.complex64)

    y = sigmoid_complex(x)
    y = jax.block_until_ready(y)

    # Reference check against plain JAX (exact sigmoid -> tight tolerance).
    y_ref = (jax.nn.sigmoid(xr) + 1j * jax.nn.sigmoid(xi)).astype(jnp.complex64)
    assert y.shape == x.shape and y.dtype == jnp.complex64
    assert jnp.allclose(y, y_ref, atol=1e-5, rtol=1e-5)

    print("KERNEL_OK")
</pallas_src>

<mosaic_0001>
module attributes {stable_mosaic.version = 11 : i64} {
  func.func @_sigmoid_kernel(%arg0: i32, %arg1: memref<16x128xf32, #tpu.memory_space<vmem>>, %arg2: memref<16x128xf32, #tpu.memory_space<vmem>>, %arg3: memref<16x128xf32, #tpu.memory_space<vmem>>, %arg4: memref<16x128xf32, #tpu.memory_space<vmem>>) attributes {dimension_semantics = [#tpu.dimension_semantics<parallel>], iteration_bounds = array<i64: 1>, scalar_prefetch = 0 : i64, scratch_operands = 0 : i64, tpu.core_type = #tpu.core_type<tc>, window_params = [{transform_indices = @transform_0, window_bounds = array<i64: 16, 128>}, {transform_indices = @transform_1, window_bounds = array<i64: 16, 128>}, {transform_indices = @transform_2, window_bounds = array<i64: 16, 128>}, {transform_indices = @transform_3, window_bounds = array<i64: 16, 128>}]} {
    %c0 = arith.constant 0 : index
    %c0_0 = arith.constant 0 : index
    %0 = vector.load %arg1[%c0, %c0_0] : memref<16x128xf32, #tpu.memory_space<vmem>>, vector<16x128xf32>
    %cst = arith.constant 0.000000e+00 : f32
    %1 = vector.broadcast %cst : f32 to vector<16x128xf32>
    %2 = arith.subf %1, %0 : vector<16x128xf32>
    %3 = math.exp %2 : vector<16x128xf32>
    %cst_1 = arith.constant 1.000000e+00 : f32
    %4 = vector.broadcast %cst_1 : f32 to vector<16x128xf32>
    %5 = arith.addf %4, %3 : vector<16x128xf32>
    %cst_2 = arith.constant 1.000000e+00 : f32
    %6 = vector.broadcast %cst_2 : f32 to vector<16x128xf32>
    %7 = arith.divf %6, %5 : vector<16x128xf32>
    %c0_3 = arith.constant 0 : index
    %c0_4 = arith.constant 0 : index
    %8 = vector.load %arg3[%c0_3, %c0_4] : memref<16x128xf32, #tpu.memory_space<vmem>>, vector<16x128xf32>
    tpu.vector_store %arg3[%c0_3, %c0_4], %7 {strides = array<i32>} : memref<16x128xf32, #tpu.memory_space<vmem>>, vector<16x128xf32>,
    %c0_5 = arith.constant 0 : index
    %c0_6 = arith.constant 0 : index
    %9 = vector.load %arg2[%c0_5, %c0_6] : memref<16x128xf32, #tpu.memory_space<vmem>>, vector<16x128xf32>
    %cst_7 = arith.constant 0.000000e+00 : f32
    %10 = vector.broadcast %cst_7 : f32 to vector<16x128xf32>
    %11 = arith.subf %10, %9 : vector<16x128xf32>
    %12 = math.exp %11 : vector<16x128xf32>
    %cst_8 = arith.constant 1.000000e+00 : f32
    %13 = vector.broadcast %cst_8 : f32 to vector<16x128xf32>
    %14 = arith.addf %13, %12 : vector<16x128xf32>
    %cst_9 = arith.constant 1.000000e+00 : f32
    %15 = vector.broadcast %cst_9 : f32 to vector<16x128xf32>
    %16 = arith.divf %15, %14 : vector<16x128xf32>
    %c0_10 = arith.constant 0 : index
    %c0_11 = arith.constant 0 : index
    %17 = vector.load %arg4[%c0_10, %c0_11] : memref<16x128xf32, #tpu.memory_space<vmem>>, vector<16x128xf32>
    tpu.vector_store %arg4[%c0_10, %c0_11], %16 {strides = array<i32>} : memref<16x128xf32, #tpu.memory_space<vmem>>, vector<16x128xf32>,
    return
  }
  func.func @transform_0(%arg0: i32) -> (i32, i32) {
    %c0_i32 = arith.constant 0 : i32
    %c0_i32_0 = arith.constant 0 : i32
    return %arg0, %c0_i32 : i32, i32
  }
  func.func @transform_1(%arg0: i32) -> (i32, i32) {
    %c0_i32 = arith.constant 0 : i32
    %c0_i32_0 = arith.constant 0 : i32
    return %arg0, %c0_i32 : i32, i32
  }
  func.func @transform_2(%arg0: i32) -> (i32, i32) {
    %c0_i32 = arith.constant 0 : i32
    %c0_i32_0 = arith.constant 0 : i32
    return %arg0, %c0_i32 : i32, i32
  }
  func.func @transform_3(%arg0: i32) -> (i32, i32) {
    %c0_i32 = arith.constant 0 : i32
    %c0_i32_0 = arith.constant 0 : i32
    return %arg0, %c0_i32 : i32, i32
  }
}

</mosaic_0001>

<bundles_post_ra>
// kernel: custom-call
= control target key start
LH: loop header
LB: loop body
LE: loop exit
PB: predicated region body
PF: predicated region fallthrough
CT: control target
= control target key end

     0   :  { %2 = vsyncpa [#allocation0], 0  ;;  %s47_s0 = inlined_call_operand.hbm [shape: c64[2,4,16,16], index: 0, kind: input, shape index: {}]   ;;  %s48_s1 = inlined_call_operand.vmem [shape: f32[2,4,16,16], index: 1, kind: output, shape index: {}]  }
   0x1   :  { %s3_s8 = sshll.u32 %s48_s1, 4  ;;  %s4_s8 = int_to_ptr.vmem [resolvable:$true] %s3_s8 }
   0x2   :  { %s17_s9 = scalar_lea.vmem %s4_s8, 2048  ;;  %p22_p1 = scmp.lt.s32.totalorder %s4_s8, %s4_s8 }
   0x3   :  { %p18_p0 = scmp.ne.s32.totalorder %s4_s8, %s17_s9  ;;  %p23_p2 = scmp.lt.s32.totalorder %s17_s9, %s17_s9 }
   0x5   :  { %p24_p3 = por %p23_p2, %p22_p1 }
   0x7   :  { %p25_p4 = pnand %p24_p3, %p18_p0 }
   0x9   :  { %28 = shalt.err (!%p25_p4)  }
   0xa   :  { %6 = dma.hbm_to_vmem [thread:$0]  %s47_s0, 2048, %s4_s8, [#allocation0] }
   0xb   :  { %29 = dma.done.wait [#allocation0], 2048  }
   0xc   :  { %30 = vsyncadd [#allocation0], 4294965248 }
   0xd   :  { %8 = vsyncpa [#allocation0], 1 }

// kernel: custom-call.1
= control target key start
LH: loop header
LB: loop body
LE: loop exit
PB: predicated region body
PF: predicated region fallthrough
CT: control target
= control target key end

     0   :  { %s51_s0 = inlined_call_operand.hbm [shape: c64[2,4,16,16], index: 0, kind: input, shape index: {}]   ;;  %s52_s1 = inlined_call_operand.vmem [shape: f32[2,4,16,16], index: 1, kind: output, shape index: {}]  }
   0x1   :  { %s2_s8 = scalar_lea.hbm %s51_s0, 2048 }
   0x2   :  { %3 = vsyncpa [#allocation0], 0  ;;  %s4_s11 = sshll.u32 %s52_s1, 4  ;;  %s5_s11 = int_to_ptr.vmem [resolvable:$true] %s4_s11 }
   0x3   :  { %s20_s12 = scalar_lea.vmem %s5_s11, 2048  ;;  %p25_p1 = scmp.lt.s32.totalorder %s5_s11, %s5_s11 }
   0x4   :  { %p21_p0 = scmp.ne.s32.totalorder %s5_s11, %s20_s12  ;;  %p26_p2 = scmp.lt.s32.totalorder %s20_s12, %s20_s12 }
   0x6   :  { %p27_p3 = por %p26_p2, %p25_p1 }
   0x8   :  { %p28_p4 = pnand %p27_p3, %p21_p0 }
   0xa   :  { %31 = shalt.err (!%p28_p4)  }
   0xb   :  { %7 = dma.hbm_to_vmem [thread:$0]  %s2_s8, 2048, %s5_s11, [#allocation0] }
   0xc   :  { %33 = dma.done.wait [#allocation0], 2048  }
   0xd   :  { %34 = vsyncadd [#allocation0], 4294965248 }
   0xe   :  { %9 = vsyncpa [#allocation0], 1 }

// kernel: custom-call.2
= control target key start
LH: loop header
LB: loop body
LE: loop exit
PB: predicated region body
PF: predicated region fallthrough
CT: control target
= control target key end

     0   :  { %s92_s0 = inlined_call_operand.vmem [shape: f32[2,4,16,16], index: 0, kind: input, shape index: {}]   ;;  %s93_s1 = inlined_call_operand.vmem [shape: f32[2,4,16,16], index: 1, kind: input, shape index: {}]   ;;  %s94_s2 = inlined_call_operand.hbm [shape: c64[2,4,16,16], index: 2, kind: output, shape index: {}]  }
   0x1   :  { %s3_s11 = scalar_lea.hbm %s94_s2, 2048 }
   0x2   :  { %4 = vsyncpa [#allocation0], 0  ;;  %s5_s14 = sshll.u32 %s92_s0, 4  ;;  %s6_s14 = int_to_ptr.vmem [resolvable:$true] %s5_s14 }
   0x3   :  { %s18_s15 = scalar_lea.vmem %s6_s14, 2048  ;;  %p23_p1 = scmp.lt.s32.totalorder %s6_s14, %s6_s14 }
   0x4   :  { %p19_p0 = scmp.ne.s32.totalorder %s6_s14, %s18_s15  ;;  %p24_p2 = scmp.lt.s32.totalorder %s18_s15, %s18_s15 }
   0x6   :  { %p25_p3 = por %p24_p2, %p23_p1 }
   0x8   :  { %p26_p4 = pnand %p25_p3, %p19_p0 }
   0xa   :  { %29 = shalt.err (!%p26_p4)  }
   0xb   :  { %8 = dma.vmem_to_hbm [thread:$0]  %s6_s14, 2048, %s94_s2, [#allocation0] }
   0xc   :  { %61 = dma.done.wait [#allocation0], 2048  }
   0xd   :  { %62 = vsyncadd [#allocation0], 4294965248 }
   0xe   :  { %10 = vsyncpa [#allocation0], 1 }
   0xf   :  { %11 = vsyncpa [#allocation1], 0  ;;  %s12_s0 = sshll.u32 %s93_s1, 4  ;;  %s13_s0 = int_to_ptr.vmem [resolvable:$true] %s12_s0 }
  0x10   :  { %s38_s20 = scalar_lea.vmem %s13_s0, 2048  ;;  %p43_p6 = scmp.lt.s32.totalorder %s13_s0, %s13_s0 }
  0x11   :  { %p39_p5 = scmp.ne.s32.totalorder %s13_s0, %s38_s20  ;;  %p44_p7 = scmp.lt.s32.totalorder %s38_s20, %s38_s20 }
  0x13   :  { %p45_p8 = por %p44_p7, %p43_p6 }
  0x15   :  { %p46_p9 = pnand %p45_p8, %p39_p5 }
  0x17   :  { %49 = shalt.err (!%p46_p9)  }
  0x18   :  { %15 = dma.vmem_to_hbm [thread:$0]  %s13_s0, 2048, %s3_s11, [#allocation1] }
  0x19   :  { %63 = dma.done.wait [#allocation1], 2048  }
  0x1a   :  { %64 = vsyncadd [#allocation1], 4294965248 }
  0x1b   :  { %17 = vsyncpa [#allocation1], 1 }

// kernel: sigmoid_complex.1
= control target key start
LH: loop header
LB: loop body
LE: loop exit
PB: predicated region body
PF: predicated region fallthrough
CT: control target
= control target key end

     0   :  { %s113_s0 = inlined_call_operand.vmem [shape: f32[16,128], index: 0, kind: input, shape index: {}, may-alias: {0,2}]   ;;  %s114_s1 = inlined_call_operand.vmem [shape: f32[16,128], index: 1, kind: input, shape index: {}, may-alias: {1,3}]   ;;  %s115_s2 = inlined_call_operand.vmem [shape: f32[16,128], index: 2, kind: output, shape index: {0}, may-alias: {0,2}]   ;;  %s116_s3 = inlined_call_operand.vmem [shape: f32[16,128], index: 3, kind: output, shape index: {1}, may-alias: {1,3}]  }
   0x1   :  { %v13_v0 = vld [vmem:[%s113_s0] sm:$0xff]  ;;  %v14_v1 = vld [vmem:[%s113_s0 + $0x8] sm:$0xff] }
   0x2   :  { %v29_v2 = vld [vmem:[%s114_s1] sm:$0xff]  ;;  %v15_v3 = vsub.f32 0.0, %v13_v0  ;;  %v16_v4 = vsub.f32 0.0, %v14_v1  ;;  %v30_v6 = vld [vmem:[%s114_s1 + $0x8] sm:$0xff] }
   0x3   :  { %v31_v5 = vsub.f32 0.0, %v29_v2  ;;  %v32_v7 = vsub.f32 0.0, %v30_v6 }
   0x4   :  { %v17_v8 = vmul.f32 1.442695, %v15_v3  ;;  %v19_v9 = vmul.f32 1.442695, %v16_v4 }
   0x5   :  { %v33_v10 = vmul.f32 1.442695, %v31_v5  ;;  %v35_v11 = vmul.f32 1.442695, %v32_v7 }
   0x6   :  { %53 = vpow2.f32 %v17_v8 }
   0x7   :  { %55 = vpow2.f32 %v19_v9 }
   0x8   :  { %57 = vpow2.f32 %v33_v10 }
   0x9   :  { %59 = vpow2.f32 %v35_v11 }
  0x13   :  { %v54_v12 = vpop.eup %53 }
  0x14   :  { %v56_v13 = vpop.eup %55  ;;  %v21_v14 = vadd.f32 1.0, %v54_v12 }
  0x15   :  { %v58_v15 = vpop.eup %57  ;;  %v22_v16 = vadd.f32 1.0, %v56_v13 }
  0x16   :  { %v60_v17 = vpop.eup %59  ;;  %61 = vrcp.f32 %v21_v14  ;;  %v37_v18 = vadd.f32 1.0, %v58_v15 }
  0x17   :  { %63 = vrcp.f32 %v22_v16  ;;  %v38_v19 = vadd.f32 1.0, %v60_v17 }
  0x18   :  { %65 = vrcp.f32 %v37_v18 }
  0x19   :  { %67 = vrcp.f32 %v38_v19 }
  0x23   :  { %v62_v20 = vpop.eup %61 }
  0x24   :  { %v64_v21 = vpop.eup %63  ;;  %27 = vst [vmem:[%s115_s2] sm:$0xff] %v62_v20 }
  0x25   :  { %v66_v22 = vpop.eup %65  ;;  %28 = vst [vmem:[%s115_s2 + $0x8] sm:$0xff] %v64_v21 }
  0x26   :  { %v68_v23 = vpop.eup %67  ;;  %43 = vst [vmem:[%s116_s3] sm:$0xff] %v66_v22 }
  0x27   :  { %44 = vst [vmem:[%s116_s3 + $0x8] sm:$0xff] %v68_v23 }

</bundles_post_ra>
